<compile_context>
chip_gen: v7x
topology: tpu7x:2x2x1
jax: 0.10.0
libtpu: 0.0.40
codegen_flags: <defaults>
</compile_context>

<pallas_src>
import math
import functools

import jax
import jax.numpy as jnp
from jax.experimental import pallas as pl
from jax.experimental.pallas import tpu as pltpu


def arc_kernel(x_ref, w_ref, labels_ref, out_ref, *, s, cos_m, sin_m, th, mm, tn):
    # ---- fused weight L2-normalization (f32 math, bf16 MXU operand) --------
    w32 = w_ref[...].astype(jnp.float32)                               # (TN, D)
    inv_norm = jax.lax.rsqrt(jnp.sum(w32 * w32, axis=1, keepdims=True) + 1e-12)
    w_n = (w32 * inv_norm).astype(jnp.bfloat16)

    x = x_ref[...].astype(jnp.bfloat16)                                # (B, D)

    # cos_th = x @ normalize(W).T  -> (B, TN), f32 accumulation on the MXU.
    cos_th = jax.lax.dot_general(
        x, w_n, (((1,), (1,)), ((), ())),
        preferred_element_type=jnp.float32)
    cos_th = jnp.clip(cos_th, -1.0, 1.0)

    # ---- ArcFace margin, applied only at the label column ------------------
    # The margin modifies exactly one column per row, so instead of computing
    # sqrt / margin / selects over the whole (B, TN) tile, gather the label
    # cosine per row with a masked lane-reduce, do the O(B) margin math, and
    # write it back with one select.  (If the label is not in this class
    # tile, is_label is all-False for that row and the row is untouched.)
    lab_local = labels_ref[...] - pl.program_id(0) * tn                # (B, 1)
    cols = jax.lax.broadcasted_iota(jnp.int32, cos_th.shape, 1)        # (B, TN)
    is_label = cols == lab_local                                       # (B, TN)

    cos_lab = jnp.sum(jnp.where(is_label, cos_th, 0.0),
                      axis=1, keepdims=True)                           # (B, 1)
    sin_lab = jnp.sqrt(jnp.maximum(1.0 - cos_lab * cos_lab, 0.0))
    cos_lab_m = cos_lab * cos_m - sin_lab * sin_m
    # torch.where(cos>th, ...) plus the redundant masked re-assign in the
    # reference module collapse to this single select:
    cos_lab_m = jnp.where(cos_lab > th, cos_lab_m, cos_lab - mm)

    out = jnp.where(is_label, cos_lab_m, cos_th) * s
    out_ref[...] = out.astype(out_ref.dtype)


def _vmem_limit_bytes():
    """Generation-aware scoped-VMEM budget: ~96 MiB on 128-MiB chips
    (v5e/v6e), ~48 MiB on v7x (64 MiB physical); conservative 32 MiB if the
    hardware query is unavailable."""
    cap = None
    try:
        info = pltpu.get_tpu_info()
        cap = getattr(info, "vmem_capacity_bytes", None)
    except Exception:
        cap = None
    if not cap:
        return 32 * 1024 * 1024
    return min(int(cap) * 3 // 4, 96 * 1024 * 1024)


def _pick_class_tile(N, tn_req, B, D, vmem_limit):
    """Largest class tile that (a) divides N, (b) is lane-dense (multiple of
    128, or the full N), (c) fits the VMEM budget including double-buffered
    streams and in-kernel f32 temporaries, and (d) leaves >= 2 class tiles so
    the "parallel" grid axis can shard across v7x's two TensorCores."""
    if N % 128 != 0:
        return N  # full-extent block (allowed by the (8,128) rule)

    budget = int(vmem_limit * 0.7)  # leave headroom for compiler scratch

    def fits(t):
        w_stream = 2 * (t * D * 2)          # double-buffered bf16 weight block
        o_stream = 2 * (B * t * 4)          # double-buffered output tile
        live = (t * D * 4                   # f32 upcast of the weight block
                + t * D * 2                 # normalized bf16 copy
                + 3 * B * t * 4             # cos_th / masks / select temps
                + B * D * 4)                # resident embeddings
        return w_stream + o_stream + live <= budget

    cands = [t for t in range(128, N + 1, 128)
             if N % t == 0 and t <= max(128, tn_req) and fits(t)]
    tn = max(cands) if cands else 128
    if N // tn == 1 and N % 256 == 0:
        tn = N // 2                          # keep 2 tiles for 2 TensorCores
    return tn


def arc_module_forward(inputs, weight, labels, *, s=65.0, m=0.5,
                       tn=2048, out_dtype=jnp.float32):
    """inputs: (B, in_features); weight: (out_features, in_features) in the
    PyTorch layout, un-normalized (normalization is fused in-kernel);
    labels: (B,) int.  Returns (B, out_features) logits scaled by s."""
    B, D = inputs.shape
    N, D2 = weight.shape
    assert D == D2, "in_features mismatch between inputs and weight"

    # Ship the dominant HBM stream (the weight) in bf16.  For repeated calls
    # (inference/eval) store it bf16 in HBM once outside this wrapper.
    if weight.dtype != jnp.bfloat16:
        weight = weight.astype(jnp.bfloat16)

    cos_m = math.cos(m)
    sin_m = math.sin(m)
    th = math.cos(math.pi - m)
    mm = math.sin(math.pi - m) * m

    vmem_limit = _vmem_limit_bytes()
    tn = _pick_class_tile(N, tn, B, D, vmem_limit)
    assert N % tn == 0
    grid = (N // tn,)

    labels2d = labels.astype(jnp.int32).reshape(B, 1)

    kernel = functools.partial(
        arc_kernel, s=float(s), cos_m=cos_m, sin_m=sin_m, th=th, mm=mm, tn=tn
    )

    return pl.pallas_call(
        kernel,
        out_shape=jax.ShapeDtypeStruct((B, N), out_dtype),
        grid=grid,
        in_specs=[
            # embeddings: small, resident across all class tiles (fetched once)
            pl.BlockSpec((B, D), lambda j: (0, 0)),
            # weight: streamed over the class axis (double-buffered by Pallas);
            # deepen with pipeline_mode=pl.Buffered(3) only if profiling shows
            # the weight DMA still exposed.
            pl.BlockSpec((tn, D), lambda j: (j, 0)),
            # labels: tiny, resident
            pl.BlockSpec((B, 1), lambda j: (0, 0)),
        ],
        # lane-dense (B, TN) output tiles -> unmasked stores
        out_specs=pl.BlockSpec((B, tn), lambda j: (0, j)),
        compiler_params=pltpu.CompilerParams(
            dimension_semantics=("parallel",),   # class tiles are independent
            vmem_limit_bytes=vmem_limit,
        ),
    )(inputs, weight, labels2d)


if __name__ == "__main__":
    # Small shapes consistent with the module: batch=8, in_features=32,
    # out_features=512 classes.  Tile picker -> tn=256, grid of 2 class tiles.
    B, IN_F, OUT_F = 8, 32, 512
    S, M = 65.0, 0.5

    key = jax.random.PRNGKey(0)
    k_x, k_w, k_l = jax.random.split(key, 3)

    x = jax.random.normal(k_x, (B, IN_F), dtype=jnp.float32)

    # Xavier-normal init (out_features, in_features): std = sqrt(2/(fan_in+fan_out))
    xavier_std = math.sqrt(2.0 / (IN_F + OUT_F))
    weight = jax.random.normal(k_w, (OUT_F, IN_F), dtype=jnp.float32) * xavier_std

    labels = jax.random.randint(k_l, (B,), 0, OUT_F, dtype=jnp.int32)

    out = arc_module_forward(x, weight, labels, s=S, m=M)
    out = jax.block_until_ready(out)

    # Pure-JAX reference mirroring the kernel's bf16 matmul path.
    cos_m, sin_m = math.cos(M), math.sin(M)
    th, mm = math.cos(math.pi - M), math.sin(math.pi - M) * M
    w_bf = weight.astype(jnp.bfloat16)
    w32 = w_bf.astype(jnp.float32)
    inv_norm = jax.lax.rsqrt(jnp.sum(w32 * w32, axis=1, keepdims=True) + 1e-12)
    w_n = (w32 * inv_norm).astype(jnp.bfloat16)
    cos_th = jnp.dot(x.astype(jnp.bfloat16), w_n.T,
                     preferred_element_type=jnp.float32)
    cos_th = jnp.clip(cos_th, -1.0, 1.0)
    sin_th = jnp.sqrt(jnp.maximum(1.0 - cos_th ** 2, 0.0))
    cos_th_m = jnp.where(cos_th > th, cos_th * cos_m - sin_th * sin_m, cos_th - mm)
    onehot = jax.nn.one_hot(labels, OUT_F, dtype=jnp.float32)
    ref = (onehot * cos_th_m + (1.0 - onehot) * cos_th) * S

    err = float(jnp.max(jnp.abs(out - ref)))
    assert jnp.allclose(out, ref, atol=5e-2, rtol=1e-3), err

    print("KERNEL_OK")
</pallas_src>

<mosaic_0001>
module attributes {stable_mosaic.version = 11 : i64} {
  func.func @arc_kernel(%arg0: i32, %arg1: memref<8x32xf32, #tpu.memory_space<vmem>>, %arg2: memref<256x32xbf16, #tpu.memory_space<vmem>>, %arg3: memref<8x1xi32, #tpu.memory_space<vmem>>, %arg4: memref<8x256xf32, #tpu.memory_space<vmem>>) attributes {dimension_semantics = [#tpu.dimension_semantics<parallel>], iteration_bounds = array<i64: 2>, scalar_prefetch = 0 : i64, scratch_operands = 0 : i64, tpu.core_type = #tpu.core_type<tc>, window_params = [{pipeline_mode = #tpu.pipeline_mode<synchronous>, transform_indices = @transform_0, window_bounds = array<i64: 8, 32>}, {transform_indices = @transform_1, window_bounds = array<i64: 256, 32>}, {pipeline_mode = #tpu.pipeline_mode<synchronous>, transform_indices = @transform_2, window_bounds = array<i64: 8, 1>}, {transform_indices = @transform_3, window_bounds = array<i64: 8, 256>}]} {
    %c0 = arith.constant 0 : index
    %c0_0 = arith.constant 0 : index
    %0 = vector.load %arg2[%c0, %c0_0] : memref<256x32xbf16, #tpu.memory_space<vmem>>, vector<256x32xbf16>
    %1 = arith.extf %0 : vector<256x32xbf16> to vector<256x32xf32>
    %2 = arith.mulf %1, %1 : vector<256x32xf32>
    %cst = arith.constant dense<0.000000e+00> : vector<256xf32>
    %3 = vector.multi_reduction <add>, %2, %cst [1] : vector<256x32xf32> to vector<256xf32>
    %4 = vector.shape_cast %3 : vector<256xf32> to vector<256x1xf32>
    %cst_1 = arith.constant 9.99999996E-13 : f32
    %5 = vector.broadcast %cst_1 : f32 to vector<256x1xf32>
    %6 = arith.addf %4, %5 : vector<256x1xf32>
    %7 = math.rsqrt %6 : vector<256x1xf32>
    %8 = vector.broadcast %7 : vector<256x1xf32> to vector<256x32xf32>
    %9 = arith.mulf %1, %8 : vector<256x32xf32>
    %10 = arith.truncf %9 : vector<256x32xf32> to vector<256x32xbf16>
    %c0_2 = arith.constant 0 : index
    %c0_3 = arith.constant 0 : index
    %11 = vector.load %arg1[%c0_2, %c0_3] : memref<8x32xf32, #tpu.memory_space<vmem>>, vector<8x32xf32>
    %12 = arith.truncf %11 : vector<8x32xf32> to vector<8x32xbf16>
    %cst_4 = arith.constant dense<0.000000e+00> : vector<8x256xf32>
    %13 = tpu.matmul %12, %10, %cst_4 {dimension_numbers = #tpu.dot_dimension_numbers<[1], [1], [0], [0], [0, 0, 1, 0], [], []>} : vector<8x32xbf16>, vector<256x32xbf16>, vector<8x256xf32> -> vector<8x256xf32>
    %cst_5 = arith.constant -1.000000e+00 : f32
    %cst_6 = arith.constant 1.000000e+00 : f32
    %14 = vector.broadcast %cst_5 : f32 to vector<8x256xf32>
    %15 = arith.maximumf %14, %13 : vector<8x256xf32>
    %16 = vector.broadcast %cst_6 : f32 to vector<8x256xf32>
    %17 = arith.minimumf %16, %15 : vector<8x256xf32>
    %c0_7 = arith.constant 0 : index
    %c0_8 = arith.constant 0 : index
    %18 = vector.load %arg3[%c0_7, %c0_8] : memref<8x1xi32, #tpu.memory_space<vmem>>, vector<8x1xi32>
    %c256_i32 = arith.constant 256 : i32
    %19 = arith.muli %arg0, %c256_i32 : i32
    %20 = vector.broadcast %19 : i32 to vector<8x1xi32>
    %21 = arith.subi %18, %20 : vector<8x1xi32>
    %22 = tpu.iota {dimensions = array<i32: 1>} : vector<8x256xi32>
    %23 = vector.broadcast %21 : vector<8x1xi32> to vector<8x256xi32>
    %24 = arith.cmpi eq, %22, %23 : vector<8x256xi32>
    %cst_9 = arith.constant 0.000000e+00 : f32
    %25 = vector.broadcast %cst_9 : f32 to vector<8x256xf32>
    %26 = arith.select %24, %17, %25 : vector<8x256xi1>, vector<8x256xf32>
    %cst_10 = arith.constant dense<0.000000e+00> : vector<8xf32>
    %27 = vector.multi_reduction <add>, %26, %cst_10 [1] : vector<8x256xf32> to vector<8xf32>
    %28 = vector.shape_cast %27 : vector<8xf32> to vector<8x1xf32>
    %29 = arith.mulf %28, %28 : vector<8x1xf32>
    %cst_11 = arith.constant 1.000000e+00 : f32
    %30 = vector.broadcast %cst_11 : f32 to vector<8x1xf32>
    %31 = arith.subf %30, %29 : vector<8x1xf32>
    %cst_12 = arith.constant 0.000000e+00 : f32
    %32 = vector.broadcast %cst_12 : f32 to vector<8x1xf32>
    %33 = arith.maximumf %31, %32 : vector<8x1xf32>
    %34 = math.sqrt %33 : vector<8x1xf32>
    %cst_13 = arith.constant 0.87758255 : f32
    %35 = vector.broadcast %cst_13 : f32 to vector<8x1xf32>
    %36 = arith.mulf %28, %35 : vector<8x1xf32>
    %cst_14 = arith.constant 0.47942555 : f32
    %37 = vector.broadcast %cst_14 : f32 to vector<8x1xf32>
    %38 = arith.mulf %34, %37 : vector<8x1xf32>
    %39 = arith.subf %36, %38 : vector<8x1xf32>
    %cst_15 = arith.constant -0.87758255 : f32
    %40 = vector.broadcast %cst_15 : f32 to vector<8x1xf32>
    %41 = arith.cmpf ogt, %28, %40 : vector<8x1xf32>
    %cst_16 = arith.constant 0.239712775 : f32
    %42 = vector.broadcast %cst_16 : f32 to vector<8x1xf32>
    %43 = arith.subf %28, %42 : vector<8x1xf32>
    %44 = arith.select %41, %39, %43 : vector<8x1xi1>, vector<8x1xf32>
    %45 = vector.shape_cast %44 : vector<8x1xf32> to vector<8x1xf32>
    %46 = vector.broadcast %45 : vector<8x1xf32> to vector<8x256xf32>
    %47 = arith.select %24, %46, %17 : vector<8x256xi1>, vector<8x256xf32>
    %cst_17 = arith.constant 6.500000e+01 : f32
    %48 = vector.broadcast %cst_17 : f32 to vector<8x256xf32>
    %49 = arith.mulf %47, %48 : vector<8x256xf32>
    %c0_18 = arith.constant 0 : index
    %c0_19 = arith.constant 0 : index
    %50 = vector.load %arg4[%c0_18, %c0_19] : memref<8x256xf32, #tpu.memory_space<vmem>>, vector<8x256xf32>
    tpu.vector_store %arg4[%c0_18, %c0_19], %49 {strides = array<i32>} : memref<8x256xf32, #tpu.memory_space<vmem>>, vector<8x256xf32>,
    return
  }
  func.func @transform_0(%arg0: i32) -> (i32, i32) {
    %c0_i32 = arith.constant 0 : i32
    %c0_i32_0 = arith.constant 0 : i32
    %c0_i32_1 = arith.constant 0 : i32
    return %c0_i32, %c0_i32_0 : i32, i32
  }
  func.func @transform_1(%arg0: i32) -> (i32, i32) {
    %c0_i32 = arith.constant 0 : i32
    %c0_i32_0 = arith.constant 0 : i32
    return %arg0, %c0_i32 : i32, i32
  }
  func.func @transform_2(%arg0: i32) -> (i32, i32) {
    %c0_i32 = arith.constant 0 : i32
    %c0_i32_0 = arith.constant 0 : i32
    %c0_i32_1 = arith.constant 0 : i32
    return %c0_i32, %c0_i32_0 : i32, i32
  }
  func.func @transform_3(%arg0: i32) -> (i32, i32) {
    %c0_i32 = arith.constant 0 : i32
    %c0_i32_0 = arith.constant 0 : i32
    return %c0_i32, %arg0 : i32, i32
  }
}

</mosaic_0001>

<bundles_post_ra>
// kernel: tpu_custom_call.1
= control target key start
LH: loop header
LB: loop body
LE: loop exit
PB: predicated region body
PF: predicated region fallthrough
CT: control target
= control target key end

     0   :  { %8 = vsyncpa [#allocation3], 0  ;;  %s1350_s0 = inlined_call_operand.vmem [shape: f32[8,32], index: 0, kind: input, shape index: {}]   ;;  %s1351_s1 = inlined_call_operand.vmem [shape: bf16[512,32], index: 1, kind: input, shape index: {}]   ;;  %s1352_s2 = inlined_call_operand.vmem [shape: s32[8,1], index: 2, kind: input, shape index: {}]   ;;  %s1353_s3 = inlined_call_operand.hbm [shape: f32[8,512], index: 3, kind: output, shape index: {}]  }
   0x1   :  { %10 = vsyncpa [#allocation3 + $0x1], 0  ;;  %s1005_s12 = smov 0   ;;  %s1007_s13 = smov 0  }
   0x2   :  { %s1009_s14 = smov 0   ;;  %s1011_s15 = smov 0  }
   0x3 LB: > { %s1026_s16 = sadd.s32 4294967295, %s981_s15   ;;  %s689_s17 = sadd.s32 4294967294, %s981_s15   ;;  %s981_s15 = sphi %s1011_s15, %s1359_s15   ;;  %s977_s14 = sphi %s1009_s14, %s1358_s14   ;;  %s973_s13 = sphi %s1007_s13, %s1357_s13   ;;  %s969_s12 = sphi %s1005_s12, %s1356_s12  }
   0x4   : > { %s1030_s18 = sadd.s32 1, %s981_s15   ;;  %s91_s19 = sadd.s32 1, %s977_s14 }
   0x5   : > { %s88_s20 = ssub.s32 %s981_s15, %s1030_s18  ;;  %p101_p0 = scmp.ne.s32.totalorder %s977_s14, %s973_s13 }
   0x6   : > { %p89_p1 = scmp.eq.s32.totalorder %s88_s20, 0  ;;  %p102_p2 = scmp.eq.s32.totalorder %s1026_s16, 1 }
   0x7   : > { %p107_p3 = scmp.ne.s32.totalorder %s973_s13, %s969_s12  ;;  %p108_p4 = scmp.eq.s32.totalorder %s689_s17, 1 }
   0x8   : > { %s1041_s21 = scalar_select %p89_p1, %s977_s14, %s91_s19  }
   0x9   : > { %p1043_p5 = por %p102_p2, %p101_p0  ;;  %p1047_p6 = por %p108_p4, %p107_p3 }
   0xa   : > { %p692_p7 = scmp.ge.s32.totalorder %s981_s15, 1  ;;  %p141_p8 = scmp.lt.s32.totalorder %s981_s15, 3 }
   0xc   : > { %p142_p9 = pnand %p692_p7, %p141_p8 }
   0xd   : > { %s694_s24 = sshll.u32 (!%p142_p9), %s1026_s16, 5  ;;  %vm269_vm0 = vcmask (!%p142_p9), 261120   ;;  %s699_s6 = sshll.u32 (!%p142_p9), %s1026_s16, 8 }
   0xe   : > { %145 = sbr.rel (%p142_p9) target bundleno = 661 (0x295), region = 32  ;;  %p166_p10 = scmp.lt.s32.totalorder (!%p142_p9), %s694_s24, 63 }
   0xf   : > { %s162_s7 = sand.u32 (!%p142_p9), 1, %s973_s13   ;;  %s1308_s19 = scalar_lea.hbm (!%p142_p9), %s1353_s3, %s699_s6 }
  0x10   : > { %s693_s8 = sshll.u32 (!%p142_p9), %s162_s7, 4  ;;  %s616_s20 = scalar_lea.sflag (!%p142_p9), [#allocation3], %s162_s7 }
  0x11   : > { %s164_s9 = scalar_lea.vmem (!%p142_p9), [#allocation2], %s693_s8 }
  0x12   : > { %s630_s10 = sshll.u32 (!%p142_p9), %s164_s9, 4  ;;  %s1310_s10 = int_to_ptr.vmem [resolvable:$true] %s630_s10 }
  0x15   : > { %s1361_s24 = smov (!%p166_p10, %s694_s24), 63 }
  0x16   : > { %s695_s25 = sshll.u32 %s1361_s24, 2  ;;  %s919_s24 = scalar_lea.vmem %s1310_s10, 256 }
  0x17   : > { %s1057_s28 = scalar_lea.vmem %s1351_s1, %s695_s25  ;;  %p920_p11 = scmp.ne.s32.totalorder %s1310_s10, %s919_s24 }
  0x18   : > { %v778_v0 = vld [vmem:[%s1057_s28 + $0x40] sm:$0xff]   ;;  %v771_v2 = vld [vmem:[%s1057_s28 + $0x8] sm:$0xff]   ;;  %v772_v22 = vld [vmem:[%s1057_s28 + $0x10] sm:$0xff]   ;;  %s984_s25 = smov [#allocation2]  }
  0x19   : > { %v708_v1 = vld [vmem:[%s1057_s28] sm:$0xff]   ;;  %v1062_v3 = vunpack.c.l.bf16 %v778_v0  ;;  %v1066_v5 = vunpack.c.h.bf16 %v778_v0  ;;  %v1070_v7 = vunpack.c.h.bf16 %v771_v2  ;;  %v1072_v8 = vunpack.c.l.bf16 %v771_v2  ;;  %v779_v13 = vld [vmem:[%s1057_s28 + $0x48] sm:$0xff]   ;;  %v780_v29 = vld [vmem:[%s1057_s28 + $0x50] sm:$0xff]   ;;  %p921_p12 = pnand %p920_p11, %p1043_p5  ;;  %s923_s16 = sshll.u32 %s984_s25, 4  ;;  %s924_s16 = int_to_ptr.vmem [resolvable:$false] %s923_s16 }
  0x1a   : > { %v1064_v4 = vunpack.c.l.bf16 %v708_v1  ;;  %v1068_v6 = vunpack.c.h.bf16 %v708_v1  ;;  %v1085_v16 = vunpack.c.h.bf16 %v779_v13  ;;  %v1087_v17 = vunpack.c.l.bf16 %v779_v13  ;;  %v773_v36 = vld [vmem:[%s1057_s28 + $0x18] sm:$0xff]   ;;  %v774_v50 = vld [vmem:[%s1057_s28 + $0x20] sm:$0xff]   ;;  %v775_v0 = vld [vmem:[%s1057_s28 + $0x28] sm:$0xff]   ;;  %s925_s26 = scalar_lea.vmem %s924_s16, 512  ;;  %p926_p0 = scmp.lt.s32.totalorder %s1310_s10, %s924_s16 }
  0x1b   : > { %v253_v9 = vmul.f32 %v1062_v3, %v1062_v3  ;;  %v254_v11 = vmul.f32 %v1066_v5, %v1066_v5  ;;  %v240_v20 = vmul.f32 %v1070_v7, %v1070_v7  ;;  %v239_v21 = vmul.f32 %v1072_v8, %v1072_v8  ;;  %v781_v43 = vld [vmem:[%s1057_s28 + $0x58] sm:$0xff]   ;;  %v782_v57 = vld [vmem:[%s1057_s28 + $0x60] sm:$0xff]   ;;  %v783_v13 = vld [vmem:[%s1057_s28 + $0x68] sm:$0xff]   ;;  %p922_p13 = pneg %p921_p12  ;;  %p927_p1 = scmp.lt.s32.totalorder %s925_s26, %s919_s24 }
  0x1c   : > { %v237_v10 = vmul.f32 %v1064_v4, %v1064_v4  ;;  %v238_v12 = vmul.f32 %v1068_v6, %v1068_v6  ;;  %v256_v23 = vmul.f32 %v1085_v16, %v1085_v16  ;;  %v255_v24 = vmul.f32 %v1087_v17, %v1087_v17 }
  0x1d   : > { %v318_v14 = vsel %vm269_vm0, %v253_v9, 0.0  ;;  %v321_v18 = vsel %vm269_vm0, %v254_v11, 0.0  ;;  %v279_v25 = vsel %vm269_vm0, %v240_v20, 0.0  ;;  %v276_v26 = vsel %vm269_vm0, %v239_v21, 0.0  ;;  %p928_p2 = por %p927_p1, %p926_p0 }
  0x1e   : > { %v270_v15 = vsel %vm269_vm0, %v237_v10, 0.0  ;;  %319 = vadd.xlane.f32.xlu1 %v318_v14  ;;  %v273_v19 = vsel %vm269_vm0, %v238_v12, 0.0  ;;  %v1102_v27 = vunpack.c.h.bf16 %v772_v22  ;;  %v1104_v28 = vunpack.c.l.bf16 %v772_v22  ;;  %v776_v22 = vld [vmem:[%s1057_s28 + $0x30] sm:$0xff]  }
  0x1f   : > { %271 = vadd.xlane.f32.xlu0 %v270_v15  ;;  %v327_v30 = vsel %vm269_vm0, %v256_v23, 0.0  ;;  %v324_v31 = vsel %vm269_vm0, %v255_v24, 0.0  ;;  %v1113_v34 = vunpack.c.h.bf16 %v780_v29  ;;  %v1115_v35 = vunpack.c.l.bf16 %v780_v29  ;;  %p929_p3 = pnand %p928_p2, %p922_p13 }
  0x20   : > { %v242_v32 = vmul.f32 %v1102_v27, %v1102_v27  ;;  %v241_v33 = vmul.f32 %v1104_v28, %v1104_v28  ;;  %v1118_v37 = vunpack.c.h.bf16 %v773_v36  ;;  %v1120_v38 = vunpack.c.l.bf16 %v773_v36 }
  0x21   : > { %v258_v41 = vmul.f32 %v1113_v34, %v1113_v34  ;;  %v257_v42 = vmul.f32 %v1115_v35, %v1115_v35  ;;  %v1129_v44 = vunpack.c.h.bf16 %v781_v43  ;;  %v1131_v45 = vunpack.c.l.bf16 %v781_v43 }
  0x22   : > { %322 = vadd.xlane.f32.xlu1 %v321_v18  ;;  %v285_v39 = vsel %vm269_vm0, %v242_v32, 0.0  ;;  %v282_v40 = vsel %vm269_vm0, %v241_v33, 0.0  ;;  %v244_v48 = vmul.f32 %v1118_v37, %v1118_v37  ;;  %v243_v49 = vmul.f32 %v1120_v38, %v1120_v38 }
  0x23   : > { %274 = vadd.xlane.f32.xlu0 %v273_v19  ;;  %v333_v46 = vsel %vm269_vm0, %v258_v41, 0.0  ;;  %v330_v47 = vsel %vm269_vm0, %v257_v42, 0.0  ;;  %v260_v51 = vmul.f32 %v1129_v44, %v1129_v44  ;;  %v1142_v52 = vunpack.c.h.bf16 %v774_v50  ;;  %v777_v42 = vld [vmem:[%s1057_s28 + $0x38] sm:$0xff]  }
  0x24   : > { %v291_v53 = vsel %vm269_vm0, %v244_v48, 0.0  ;;  %v288_v54 = vsel %vm269_vm0, %v243_v49, 0.0  ;;  %v259_v55 = vmul.f32 %v1131_v45, %v1131_v45  ;;  %v1148_v56 = vunpack.c.l.bf16 %v774_v50 }
  0x25   : > { %v339_v58 = vsel %vm269_vm0, %v260_v51, 0.0  ;;  %v246_v59 = vmul.f32 %v1142_v52, %v1142_v52  ;;  %v1157_v62 = vunpack.c.h.bf16 %v782_v57  ;;  %v1159_v63 = vunpack.c.l.bf16 %v782_v57  ;;  %v785_v51 = vld [vmem:[%s1057_s28 + $0x78] sm:$0xff]  }
  0x26   : > { %280 = vadd.xlane.f32.xlu1 %v279_v25  ;;  %v336_v60 = vsel %vm269_vm0, %v259_v55, 0.0  ;;  %v245_v61 = vmul.f32 %v1148_v56, %v1148_v56  ;;  %v1162_v1 = vunpack.c.h.bf16 %v775_v0  ;;  %v1164_v2 = vunpack.c.l.bf16 %v775_v0 }
  0x27   : > { %277 = vadd.xlane.f32.xlu0 %v276_v26  ;;  %v297_v9 = vsel %vm269_vm0, %v246_v59, 0.0  ;;  %v262_v11 = vmul.f32 %v1157_v62, %v1157_v62  ;;  %v261_v12 = vmul.f32 %v1159_v63, %v1159_v63  ;;  %v1175_v15 = vunpack.c.h.bf16 %v783_v13 }
  0x28   : > { %v294_v10 = vsel %vm269_vm0, %v245_v61, 0.0  ;;  %v248_v14 = vmul.f32 %v1162_v1, %v1162_v1  ;;  %v247_v20 = vmul.f32 %v1164_v2, %v1164_v2  ;;  %v1181_v21 = vunpack.c.l.bf16 %v783_v13 }
  0x29   : > { %v345_v18 = vsel %vm269_vm0, %v262_v11, 0.0  ;;  %v342_v19 = vsel %vm269_vm0, %v261_v12, 0.0  ;;  %v264_v23 = vmul.f32 %v1175_v15, %v1175_v15  ;;  %v1186_v24 = vunpack.c.h.bf16 %v776_v22  ;;  %v478_v12 = vld [vmem:[%s1350_s0] sm:$0xff] }
  0x2a   : > { %328 = vadd.xlane.f32.xlu1 %v327_v30  ;;  %v303_v25 = vsel %vm269_vm0, %v248_v14, 0.0  ;;  %v300_v26 = vsel %vm269_vm0, %v247_v20, 0.0  ;;  %v263_v29 = vmul.f32 %v1181_v21, %v1181_v21  ;;  %v1192_v30 = vunpack.c.l.bf16 %v776_v22  ;;  %v576_v14 = vld [vmem:[%s1352_s2] sm:$0xff] }
  0x2b   : > { %325 = vadd.xlane.f32.xlu0 %v324_v31  ;;  %v784_v31 = vld [vmem:[%s1057_s28 + $0x70] sm:$0xff]   ;;  %v351_v32 = vsel %vm269_vm0, %v264_v23, 0.0  ;;  %v250_v33 = vmul.f32 %v1186_v24, %v1186_v24  ;;  %v1206_v43 = vunpack.c.h.bf16 %v777_v42  ;;  %v1225_v59 = vunpack.c.l.bf16 %v785_v51 }
  0x2c   : > { %v348_v36 = vsel %vm269_vm0, %v263_v29, 0.0  ;;  %v1203_v41 = vunpack.c.l.bf16 %v784_v31  ;;  %v1238_v13 = vpack.c.bf16 %v478_v12, %v478_v12 }
  0x2e   : > { %286 = vadd.xlane.f32.xlu1 %v285_v39  ;;  %v249_v39 = vmul.f32 %v1192_v30, %v1192_v30  ;;  %v265_v50 = vmul.f32 %v1203_v41, %v1203_v41  ;;  %802 = vmatprep.mubr.msk.bf16.mxu0 %vm269_vm0, %v1238_v13 }
  0x2f   : > { %283 = vadd.xlane.f32.xlu0 %v282_v40  ;;  %v1201_v40 = vunpack.c.h.bf16 %v784_v31 }
  0x30   : > { %v306_v48 = vsel %vm269_vm0, %v249_v39, 0.0  ;;  %v354_v57 = vsel %vm269_vm0, %v265_v50, 0.0 }
  0x31   : > { %v266_v49 = vmul.f32 %v1201_v40, %v1201_v40 }
  0x32   : > { %334 = vadd.xlane.f32.xlu1 %v333_v46  ;;  %v1208_v46 = vunpack.c.l.bf16 %v777_v42 }
  0x33   : > { %331 = vadd.xlane.f32.xlu0 %v330_v47  ;;  %v309_v47 = vsel %vm269_vm0, %v250_v33, 0.0  ;;  %v357_v55 = vsel %vm269_vm0, %v266_v49, 0.0 }
  0x36   : > { %292 = vadd.xlane.f32.xlu1 %v291_v53  ;;  %v252_v53 = vmul.f32 %v1206_v43, %v1206_v43 }
  0x37   : > { %289 = vadd.xlane.f32.xlu0 %v288_v54  ;;  %v1219_v54 = vunpack.c.h.bf16 %v785_v51 }
  0x39   : > { %v268_v0 = vmul.f32 %v1219_v54, %v1219_v54 }
  0x3a   : > { %340 = vadd.xlane.f32.xlu1 %v339_v58  ;;  %v251_v58 = vmul.f32 %v1208_v46, %v1208_v46 }
  0x3b   : > { %337 = vadd.xlane.f32.xlu0 %v336_v60  ;;  %v315_v60 = vsel %vm269_vm0, %v252_v53, 0.0 }
  0x3c   : > { %v312_v61 = vsel %vm269_vm0, %v251_v58, 0.0 }
  0x3e   : > { %298 = vadd.xlane.f32.xlu1 %v297_v9  ;;  %v267_v9 = vmul.f32 %v1225_v59, %v1225_v59 }
  0x3f   : > { %295 = vadd.xlane.f32.xlu0 %v294_v10  ;;  %v363_v10 = vsel %vm269_vm0, %v268_v0, 0.0 }
  0x40   : > { %v360_v11 = vsel %vm269_vm0, %v267_v9, 0.0 }
  0x42   : > { %346 = vadd.xlane.f32.xlu1 %v345_v18  ;;  %v983_v18 = vmov 0  }
  0x43   : > { %343 = vadd.xlane.f32.xlu0 %v342_v19  ;;  %v578_v19 = vstv %s699_s6 }
  0x44   : > { %852 = vset.pattern.permute.xlu0 %v983_v18  ;;  %v579_v20 = vsub.s32 %v576_v14, %v578_v19 }
  0x46   : > { %304 = vadd.xlane.f32.xlu1 %v303_v25 }
  0x47   : > { %301 = vadd.xlane.f32.xlu0 %v300_v26 }
  0x4a   : > { %352 = vadd.xlane.f32.xlu1 %v351_v32 }
  0x4b   : > { %349 = vadd.xlane.f32.xlu0 %v348_v36 }
  0x4e   : > { %310 = vadd.xlane.f32.xlu1 %v309_v47 }
  0x4f   : > { %307 = vadd.xlane.f32.xlu0 %v306_v48 }
  0x52   : > { %358 = vadd.xlane.f32.xlu1 %v357_v55 }
  0x53   : > { %355 = vadd.xlane.f32.xlu0 %v354_v57 }
  0x56   : > { %316 = vadd.xlane.f32.xlu1 %v315_v60 }
  0x57   : > { %313 = vadd.xlane.f32.xlu0 %v312_v61 }
  0x5a   : > { %364 = vadd.xlane.f32.xlu1 %v363_v10 }
  0x5b   : > { %361 = vadd.xlane.f32.xlu0 %v360_v11 }
  0x71   : > { %584 = vperm.xlu0 %852, %v579_v20  }
  0xab   : > { %v320_v22 = vpop.xlane.xlu1 %319 }
  0xac   : > { %v272_v23 = vpop.xlane.xlu0 %271  ;;  %v382_v25 = vadd.f32 1e-12, %v320_v22 }
  0xad   : > { %v366_v26 = vadd.f32 1e-12, %v272_v23 }
  0xae   : > { %853 = vrsqrt.f32 %v382_v25 }
  0xaf   : > { %v323_v29 = vpop.xlane.xlu1 %322  ;;  %855 = vrsqrt.f32 %v366_v26 }
  0xb0   : > { %v275_v31 = vpop.xlane.xlu0 %274  ;;  %v383_v32 = vadd.f32 1e-12, %v323_v29 }
  0xb1   : > { %v367_v33 = vadd.f32 1e-12, %v275_v31 }
  0xb2   : > { %857 = vrsqrt.f32 %v383_v32 }
  0xb3   : > { %859 = vrsqrt.f32 %v367_v33  ;;  %v281_v36 = vpop.xlane.xlu1 %280 }
  0xb4   : > { %v278_v39 = vpop.xlane.xlu0 %277  ;;  %v369_v42 = vadd.f32 1e-12, %v281_v36 }
  0xb5   : > { %v368_v47 = vadd.f32 1e-12, %v278_v39 }
  0xb6   : > { %861 = vrsqrt.f32 %v369_v42 }
  0xb7   : > { %863 = vrsqrt.f32 %v368_v47  ;;  %v329_v48 = vpop.xlane.xlu1 %328 }
  0xb8   : > { %v326_v49 = vpop.xlane.xlu0 %325  ;;  %v385_v50 = vadd.f32 1e-12, %v329_v48  ;;  %v854_v53 = vpop.eup %853 }
  0xb9   : > { %v384_v51 = vadd.f32 1e-12, %v326_v49  ;;  %v856_v55 = vpop.eup %855  ;;  %v446_v10 = vmul.f32 %v854_v53, %v1062_v3 }
  0xba   : > { %865 = vrsqrt.f32 %v385_v50  ;;  %v430_v12 = vmul.f32 %v856_v55, %v1064_v4 }
  0xbb   : > { %867 = vrsqrt.f32 %v384_v51  ;;  %v287_v57 = vpop.xlane.xlu1 %286 }
  0xbc   : > { %v284_v58 = vpop.xlane.xlu0 %283  ;;  %v858_v60 = vpop.eup %857  ;;  %v371_v61 = vadd.f32 1e-12, %v287_v57 }
  0xbd   : > { %v370_v0 = vadd.f32 1e-12, %v284_v58  ;;  %v860_v9 = vpop.eup %859  ;;  %v447_v11 = vmul.f32 %v858_v60, %v1066_v5 }
  0xbe   : > { %869 = vrsqrt.f32 %v371_v61  ;;  %v431_v14 = vmul.f32 %v860_v9, %v1068_v6 }
  0xbf   : > { %871 = vrsqrt.f32 %v370_v0  ;;  %v335_v18 = vpop.xlane.xlu1 %334  ;;  %v470_v20 = vpack.c.bf16 %v447_v11, %v446_v10 }
  0xc0   : > { %v332_v19 = vpop.xlane.xlu0 %331  ;;  %v862_v22 = vpop.eup %861  ;;  %v387_v23 = vadd.f32 1e-12, %v335_v18  ;;  %v462_v26 = vpack.c.bf16 %v431_v14, %v430_v12 }
  0xc1   : > { %v386_v25 = vadd.f32 1e-12, %v332_v19  ;;  %v864_v29 = vpop.eup %863  ;;  %804 = vmatprep.subr.msk.bf16.mxu0 %vm269_vm0, %v470_v20  ;;  %v433_v4 = vmul.f32 %v862_v22, %v1070_v7 }
  0xc2   : > { %873 = vrsqrt.f32 %v387_v23  ;;  %v484_v3 = vsel %vm269_vm0, %v462_v26, 0  ;;  %v432_v5 = vmul.f32 %v864_v29, %v1072_v8 }
  0xc3   : > { %875 = vrsqrt.f32 %v386_v25  ;;  %787 = vmatpush3.bf16.xpose.msra.mxu0 %v484_v3  ;;  %v293_v6 = vpop.xlane.xlu1 %292 }
  0xc4   : > { %v290_v31 = vpop.xlane.xlu0 %289  ;;  %v866_v32 = vpop.eup %865  ;;  %v373_v33 = vadd.f32 1e-12, %v293_v6  ;;  %v463_v48 = vpack.c.bf16 %v433_v4, %v432_v5 }
  0xc5   : > { %v372_v36 = vadd.f32 1e-12, %v290_v31  ;;  %v868_v39 = vpop.eup %867  ;;  %v449_v42 = vmul.f32 %v866_v32, %v1085_v16 }
  0xc6   : > { %877 = vrsqrt.f32 %v373_v33  ;;  %v448_v47 = vmul.f32 %v868_v39, %v1087_v17  ;;  %v487_v57 = vsel %vm269_vm0, %v463_v48, 0 }
  0xc7   : > { %879 = vrsqrt.f32 %v372_v36  ;;  %v341_v49 = vpop.xlane.xlu1 %340 }
  0xc8   : > { %v338_v50 = vpop.xlane.xlu0 %337  ;;  %v870_v8 = vpop.eup %869  ;;  %v389_v51 = vadd.f32 1e-12, %v341_v49  ;;  %v471_v53 = vpack.c.bf16 %v449_v42, %v448_v47 }
  0xc9   : > { %v388_v7 = vadd.f32 1e-12, %v338_v50  ;;  %v872_v55 = vpop.eup %871  ;;  %v435_v16 = vmul.f32 %v870_v8, %v1102_v27 }
  0xca   : > { %881 = vrsqrt.f32 %v389_v51  ;;  %805 = vmatprep.subr.msk.bf16.mxu0 %vm269_vm0, %v471_v53  ;;  %v434_v58 = vmul.f32 %v872_v55, %v1104_v28 }
  0xcb   : > { %883 = vrsqrt.f32 %v388_v7  ;;  %789 = vmatpush3.bf16.xpose.msra.mxu0 %v487_v57  ;;  %v299_v17 = vpop.xlane.xlu1 %298 }
  0xcc   : > { %v296_v60 = vpop.xlane.xlu0 %295  ;;  %v874_v61 = vpop.eup %873  ;;  %v375_v0 = vadd.f32 1e-12, %v299_v17  ;;  %v464_v14 = vpack.c.bf16 %v435_v16, %v434_v58 }
  0xcd   : > { %v374_v9 = vadd.f32 1e-12, %v296_v60  ;;  %v876_v10 = vpop.eup %875  ;;  %v451_v11 = vmul.f32 %v874_v61, %v1113_v34 }
  0xce   : > { %885 = vrsqrt.f32 %v375_v0  ;;  %v450_v12 = vmul.f32 %v876_v10, %v1115_v35  ;;  %v490_v25 = vsel %vm269_vm0, %v464_v14, 0 }
  0xcf   : > { %887 = vrsqrt.f32 %v374_v9  ;;  %v347_v18 = vpop.xlane.xlu1 %346 }
  0xd0   : > { %v344_v19 = vpop.xlane.xlu0 %343  ;;  %v878_v28 = vpop.eup %877  ;;  %v391_v20 = vadd.f32 1e-12, %v347_v18  ;;  %v472_v22 = vpack.c.bf16 %v451_v11, %v450_v12 }
  0xd1   : > { %v390_v27 = vadd.f32 1e-12, %v344_v19  ;;  %v880_v23 = vpop.eup %879  ;;  %v437_v34 = vmul.f32 %v878_v28, %v1118_v37 }
  0xd2   : > { %889 = vrsqrt.f32 %v391_v20  ;;  %806 = vmatprep.subr.msk.bf16.mxu0 %vm269_vm0, %v472_v22  ;;  %v436_v26 = vmul.f32 %v880_v23, %v1120_v38 }
  0xd3   : > { %891 = vrsqrt.f32 %v390_v27  ;;  %791 = vmatpush3.bf16.xpose.msra.mxu0 %v490_v25  ;;  %v305_v35 = vpop.xlane.xlu1 %304 }
  0xd4   : > { %v302_v29 = vpop.xlane.xlu0 %301  ;;  %v882_v3 = vpop.eup %881  ;;  %v377_v5 = vadd.f32 1e-12, %v305_v35  ;;  %v465_v33 = vpack.c.bf16 %v437_v34, %v436_v26 }
  0xd5   : > { %v376_v4 = vadd.f32 1e-12, %v302_v29  ;;  %v884_v6 = vpop.eup %883  ;;  %v453_v31 = vmul.f32 %v882_v3, %v1129_v44 }
  0xd6   : > { %893 = vrsqrt.f32 %v377_v5  ;;  %v452_v32 = vmul.f32 %v884_v6, %v1131_v45  ;;  %v493_v49 = vsel %vm269_vm0, %v465_v33, 0 }
  0xd7   : > { %895 = vrsqrt.f32 %v376_v4  ;;  %v353_v36 = vpop.xlane.xlu1 %352 }
  0xd8   : > { %v350_v39 = vpop.xlane.xlu0 %349  ;;  %v886_v38 = vpop.eup %885  ;;  %v393_v42 = vadd.f32 1e-12, %v353_v36  ;;  %v473_v47 = vpack.c.bf16 %v453_v31, %v452_v32 }
  0xd9   : > { %v392_v37 = vadd.f32 1e-12, %v350_v39  ;;  %v888_v48 = vpop.eup %887  ;;  %v439_v44 = vmul.f32 %v886_v38, %v1142_v52 }
  0xda   : > { %897 = vrsqrt.f32 %v393_v42  ;;  %807 = vmatprep.subr.msk.bf16.mxu0 %vm269_vm0, %v473_v47  ;;  %v438_v50 = vmul.f32 %v888_v48, %v1148_v56 }
  0xdb   : > { %899 = vrsqrt.f32 %v392_v37  ;;  %793 = vmatpush3.bf16.xpose.msra.mxu0 %v493_v49  ;;  %v311_v45 = vpop.xlane.xlu1 %310 }
  0xdc   : > { %v308_v8 = vpop.xlane.xlu0 %307  ;;  %v890_v51 = vpop.eup %889  ;;  %v379_v7 = vadd.f32 1e-12, %v311_v45  ;;  %v466_v16 = vpack.c.bf16 %v439_v44, %v438_v50 }
  0xdd   : > { %v378_v53 = vadd.f32 1e-12, %v308_v8  ;;  %v892_v55 = vpop.eup %891  ;;  %v455_v57 = vmul.f32 %v890_v51, %v1157_v62 }
  0xde   : > { %901 = vrsqrt.f32 %v379_v7  ;;  %v454_v58 = vmul.f32 %v892_v55, %v1159_v63  ;;  %v496_v10 = vsel %vm269_vm0, %v466_v16, 0 }
  0xdf   : > { %903 = vrsqrt.f32 %v378_v53  ;;  %v359_v17 = vpop.xlane.xlu1 %358 }
  0xe0   : > { %v356_v60 = vpop.xlane.xlu0 %355  ;;  %v894_v56 = vpop.eup %893  ;;  %v395_v61 = vadd.f32 1e-12, %v359_v17  ;;  %v474_v0 = vpack.c.bf16 %v455_v57, %v454_v58 }
  0xe1   : > { %v394_v52 = vadd.f32 1e-12, %v356_v60  ;;  %v896_v9 = vpop.eup %895  ;;  %v441_v62 = vmul.f32 %v894_v56, %v1162_v1 }
  0xe2   : > { %905 = vrsqrt.f32 %v395_v61  ;;  %808 = vmatprep.subr.msk.bf16.mxu0 %vm269_vm0, %v474_v0  ;;  %v440_v11 = vmul.f32 %v896_v9, %v1164_v2 }
  0xe3   : > { %907 = vrsqrt.f32 %v394_v52  ;;  %795 = vmatpush3.bf16.xpose.msra.mxu0 %v496_v10  ;;  %v317_v63 = vpop.xlane.xlu1 %316 }
  0xe4   : > { %v314_v12 = vpop.xlane.xlu0 %313  ;;  %v898_v14 = vpop.eup %897  ;;  %v381_v18 = vadd.f32 1e-12, %v317_v63  ;;  %v467_v22 = vpack.c.bf16 %v441_v62, %v440_v11 }
  0xe5   : > { %v380_v19 = vadd.f32 1e-12, %v314_v12  ;;  %v900_v28 = vpop.eup %899  ;;  %v457_v20 = vmul.f32 %v898_v14, %v1175_v15 }
  0xe6   : > { %909 = vrsqrt.f32 %v381_v18  ;;  %v456_v27 = vmul.f32 %v900_v28, %v1181_v21  ;;  %v499_v29 = vsel %vm269_vm0, %v467_v22, 0 }
  0xe7   : > { %911 = vrsqrt.f32 %v380_v19  ;;  %v365_v23 = vpop.xlane.xlu1 %364 }
  0xe8   : > { %v362_v25 = vpop.xlane.xlu0 %361  ;;  %v902_v2 = vpop.eup %901  ;;  %v397_v26 = vadd.f32 1e-12, %v365_v23  ;;  %v475_v34 = vpack.c.bf16 %v457_v20, %v456_v27 }
  0xe9   : > { %v396_v1 = vadd.f32 1e-12, %v362_v25  ;;  %v904_v35 = vpop.eup %903  ;;  %v443_v15 = vmul.f32 %v902_v2, %v1186_v24 }
  0xea   : > { %913 = vrsqrt.f32 %v397_v26  ;;  %809 = vmatprep.subr.msk.bf16.mxu0 %vm269_vm0, %v475_v34  ;;  %v442_v3 = vmul.f32 %v904_v35, %v1192_v30 }
  0xeb   : > { %915 = vrsqrt.f32 %v396_v1  ;;  %797 = vmatpush3.bf16.xpose.msra.mxu0 %v499_v29 }
  0xec   : > { %v906_v21 = vpop.eup %905  ;;  %v468_v31 = vpack.c.bf16 %v443_v15, %v442_v3 }
  0xed   : > { %v908_v5 = vpop.eup %907  ;;  %v459_v4 = vmul.f32 %v906_v21, %v1201_v40 }
  0xee   : > { %v458_v6 = vmul.f32 %v908_v5, %v1203_v41  ;;  %v502_v39 = vsel %vm269_vm0, %v468_v31, 0 }
  0xf0   : > { %v910_v32 = vpop.eup %909  ;;  %v476_v33 = vpack.c.bf16 %v459_v4, %v458_v6  ;;  %v585_v50 = vpop.permute.xlu0 %584 }
  0xf1   : > { %v912_v36 = vpop.eup %911  ;;  %v445_v24 = vmul.f32 %v910_v32, %v1206_v43 }
  0xf2   : > { %810 = vmatprep.subr.msk.bf16.mxu0 %vm269_vm0, %v476_v33  ;;  %v444_v30 = vmul.f32 %v912_v36, %v1208_v46  ;;  %v580_v46 = vlaneseq }
  0xf3   : > { %799 = vmatpush3.bf16.xpose.msra.mxu0 %v502_v39 }
  0xf4   : > { %v914_v38 = vpop.eup %913  ;;  %v469_v41 = vpack.c.bf16 %v445_v24, %v444_v30  ;;  %v581_v49 = vand.u32 127, %v580_v46 }
  0xf5   : > { %v916_v42 = vpop.eup %915  ;;  %v461_v37 = vmul.f32 %v914_v38, %v1219_v54 }
  0xf6   : > { %v460_v40 = vmul.f32 %v916_v42, %v1225_v59  ;;  %v505_v48 = vsel %vm269_vm0, %v469_v41, 0  ;;  %v582_v43 = vadd.s32 128, %v581_v49  ;;  %vm586_vm1 = vcmp.eq.s32.totalorder %v581_v49, %v585_v50 }
  0xf8   : > { %v477_v47 = vpack.c.bf16 %v461_v37, %v460_v40  ;;  %vm587_vm2 = vcmp.eq.s32.totalorder %v582_v43, %v585_v50 }
  0xfa   : > { %811 = vmatprep.subr.msk.bf16.mxu0 %vm269_vm0, %v477_v47 }
  0xfb   : > { %801 = vmatpush3.bf16.xpose.msra.mxu0 %v505_v48 }
 0x102   : > { %803 = vmatmul.mubr.msk.bf16.vlgmr.msra.gmra.mrb[0].mxu0 %vm269_vm0, %v1238_v13 }
 0x1d5   : > { %v565_v44 = vpop.f32.mrb[0].mxu0 }
 0x1d6   : > { %v697_v54 = vclamps-f32 %v565_v44, 1.0  ;;  %v567_v45 = vpop.f32.mrb[1].mxu0 }
 0x1d7   : > { %v698_v59 = vclamps-f32 %v567_v45, 1.0  ;;  %v569_v8 = vpop.f32.mrb[2].mxu0 }
 0x1d8   : > { %v588_v51 = vsel %vm586_vm1, %v697_v54, 0.0  ;;  %v570_v7 = vpop.f32.mrb[3].mxu0 }
 0x1d9   : > { %v589_v53 = vsel %vm587_vm2, %v698_v59, 0.0 }
 0x1da   : > { %v590_v55 = vadd.f32 %v589_v53, %v588_v51 }
 0x1dc   : > { %591 = vadd.xlane.f32.xlu1 %v590_v55 }
 0x269   : > { %v592_v13 = vpop.xlane.xlu1 %591 }
 0x26a   : > { %v593_v57 = vmul.f32 %v592_v13, %v592_v13  ;;  %v603_v0 = vmul.f32 0.87758255, %v592_v13  ;;  %v700_v11 = vadd.f32 -0.23971277, %v592_v13  ;;  %vm606_vm5 = vcmp.gt.f32.partialorder %v592_v13, -0.87758255 }
 0x26c   : > { %v594_v58 = vsub.f32 1.0, %v593_v57 }
 0x26e   : > { %v595_v16 = vmax.f32 %v594_v58, 0.0 }
 0x270   : > { %917 = vrsqrt.f32 %v595_v16  ;;  %vm598_vm3 = vcmp.eq.f32.partialorder %v595_v16, inf  ;;  %v601_v56 = vand.u32 2147483648, %v595_v16  ;;  %vm600_vm4 = vcmp.eq.f32.partialorder %v595_v16, 0.0 }
 0x27a   : > { %v918_v17 = vpop.eup %917 }
 0x27b   : > { %v597_v60 = vmul.f32 %v918_v17, %v595_v16 }
 0x27d   : > { %v599_v61 = vsel %vm598_vm3, %v595_v16, %v597_v60 }
 0x27e   : > { %v602_v52 = vsel %vm600_vm4, %v601_v56, %v599_v61 }
 0x27f   : > { %v604_v9 = vmul.f32 0.47942555, %v602_v52 }
 0x281   : > { %v605_v10 = vsub.f32 %v603_v0, %v604_v9 }
 0x283   : > { %v608_v62 = vsel %vm606_vm5, %v605_v10, %v700_v11 }
 0x284   : > { %v609_v63 = vsel %vm586_vm1, %v608_v62, %v697_v54  ;;  %v610_v12 = vsel %vm587_vm2, %v608_v62, %v698_v59 }
 0x285   : > { %v611_v14 = vmul.f32 65.0, %v609_v63  ;;  %v612_v18 = vmul.f32 65.0, %v610_v12 }
 0x287   : > { %613 = vst [vmem:[%s164_s9] sm:$0xff] %v611_v14  ;;  %614 = vst [vmem:[%s164_s9 + $0x8] sm:$0xff] %v612_v18 }
 0x288   : > { %932 = shalt.err (!%p929_p3)
}
 0x289   : > { %s933_s27 = scalar_lea.hbm %s1308_s19, 256  ;;  %s937_s30 = scalar_lea.hbm %s1353_s3, 512 }
 0x28a   : > { %p934_p4 = scmp.ne.s32.totalorder %s1308_s19, %s933_s27  ;;  %p938_p9 = scmp.lt.u32.totalorder %s1308_s19, %s1353_s3 }
 0x28b   : > { %p939_p10 = scmp.lt.u32.totalorder %s937_s30, %s933_s27  ;;  %p941_p12 = scmp.lt.u32.totalorder %s933_s27, %s1308_s19 }
 0x28c   : > { %p935_p7 = pnand %p934_p4, %p1043_p5 }
 0x28d   : > { %p940_p11 = por %p939_p10, %p938_p9 }
 0x28e   : > { %p936_p8 = pneg %p935_p7 }
 0x28f   : > { %p942_p13 = por %p941_p12, %p940_p11 }
 0x291   : > { %p943_p0 = pnand %p942_p13, %p936_p8 }
 0x293   : > { %946 = shalt.err (!%p943_p0)
}
 0x294   : > { %812 = dma.vmem_to_hbm [thread:$0]  (%p1043_p5), %s1310_s10, 256, %s1308_s19, %s616_s20  }
 0x295 PF: > { %p818_p1 = scmp.ge.s32.totalorder %s981_s15, 2  ;;  %s642_s6 = sand.u32 1, %s969_s12  }
 0x296   : > { %s643_s7 = scalar_lea.sflag [#allocation3], %s642_s6 }
 0x297   : > { %p815_p2 = pnand %p818_p1, %p1047_p6 }
 0x299   : > { %964 = dma.done.wait (!%p815_p2), %s643_s7, 256  }
 0x29a   : > { %966 = vsyncadd (!%p815_p2), %s643_s7, 4294967040  ;;  %p13_p3 = scmp.ge.s32.totalorder %s1030_s18, 4   ;;  %s1356_s12 = smov %s973_s13 }
 0x29b   : > { %s1357_s13 = smov %s977_s14  ;;  %s1358_s14 = smov %s1041_s21 }
 0x29c   : > { %s1359_s15 = smov %s1030_s18  ;;  %15 = sbr.rel (!%p13_p3) target bundleno = 3 (0x3), region = 67 }
 0x2a3   :  { %648 = vsyncpa [#allocation3], 1 }
 0x2a4   :  { %650 = vsyncpa [#allocation3 + $0x1], 1 }

</bundles_post_ra>
